<compile_context>
chip_gen: v5e
topology: v5e:2x2
jax: 0.10.0
libtpu: 0.0.40
codegen_flags: <defaults>
</compile_context>

<pallas_src>
import functools

import jax
import jax.numpy as jnp
from jax.experimental import pallas as pl
from jax.experimental.pallas import tpu as pltpu


def _cdiv(a, b):
    return (a + b - 1) // b


def _round_up(x, m):
    return _cdiv(x, m) * m


def _supports_bf16_eup():
    """bf16 transcendentals exist on v6e/v7x; not on v5e and older."""
    try:
        kind = jax.devices()[0].device_kind.lower()
    except Exception:
        return True
    return not any(tag in kind for tag in ("v2", "v3", "v4", "v5"))


def ffnet_kernel(x_ref,
                 w1_ref, b1_ref,
                 w2_ref, b2_ref,
                 w3_ref, b3_ref,
                 w4_ref, b4_ref,
                 o_ref, *, tanh_dtype):
    # MXU inputs in bf16, accumulation in f32; bias add in f32, tanh in
    # `tanh_dtype` (bf16 on v6e/v7x where the EUP is the binding unit,
    # f32 on v5e where the EUP has no bf16 and the kernel is MXU-bound).
    x = x_ref[...].astype(jnp.bfloat16)                       # (tm, 195)
    # layer 1: (tm, 195) @ (195, 256)   (Mosaic pads K internally)
    h = jnp.dot(x, w1_ref[...], preferred_element_type=jnp.float32)
    h = jnp.tanh((h + b1_ref[...]).astype(tanh_dtype)).astype(jnp.bfloat16)
    # layer 2: (tm, 256) @ (256, 256)
    h = jnp.dot(h, w2_ref[...], preferred_element_type=jnp.float32)
    h = jnp.tanh((h + b2_ref[...]).astype(tanh_dtype)).astype(jnp.bfloat16)
    # layer 3: (tm, 256) @ (256, 256)
    h = jnp.dot(h, w3_ref[...], preferred_element_type=jnp.float32)
    h = jnp.tanh((h + b3_ref[...]).astype(tanh_dtype)).astype(jnp.bfloat16)
    # bottleneck (lane-dense): (tm, 256) @ (256, 128); cols 8..127 are zeros.
    out = jnp.dot(h, w4_ref[...], preferred_element_type=jnp.float32)
    out = jnp.tanh((out + b4_ref[...]).astype(tanh_dtype))
    o_ref[...] = out.astype(o_ref.dtype)


def prepare_params(params, *, lane=128):
    """One-time preprocessing: bf16 weights + lane-dense bottleneck (N 8->128)."""
    (w1, b1), (w2, b2), (w3, b3), (w4, b4) = params
    d_out = w4.shape[1]
    n_pad = _round_up(d_out, lane)
    w4p = jnp.pad(w4, ((0, 0), (0, n_pad - d_out)))
    b4p = jnp.pad(b4, ((0, 0), (0, n_pad - d_out)))
    return {
        "w1": w1.astype(jnp.bfloat16), "b1": b1.astype(jnp.float32),
        "w2": w2.astype(jnp.bfloat16), "b2": b2.astype(jnp.float32),
        "w3": w3.astype(jnp.bfloat16), "b3": b3.astype(jnp.float32),
        "w4": w4p.astype(jnp.bfloat16), "b4": b4p.astype(jnp.float32),
        "d_out": d_out,
    }


def ffnet_forward(x, prepped, *, max_tile_m=2048, min_split_rows=128):
    """x: (B, input_size) float32. prepped: output of prepare_params."""
    B, d_in = x.shape
    w1, b1 = prepped["w1"], prepped["b1"]
    w2, b2 = prepped["w2"], prepped["b2"]
    w3, b3 = prepped["w3"], prepped["b3"]
    w4, b4 = prepped["w4"], prepped["b4"]
    d_out = prepped["d_out"]
    d_hidden = w2.shape[0]
    n_pad = w4.shape[1]                      # lane-dense output width (128)

    # --- balanced batch tiling (minimize padding, keep >=2 steps for v7x) ---
    n_tiles = _cdiv(B, max_tile_m)
    if n_tiles == 1 and B >= 2 * min_split_rows:
        n_tiles = 2                          # let both v7x TensorCores work
    align = 16 if B >= 16 else 8             # bf16 sublane packing
    tm = _round_up(_cdiv(B, n_tiles), align)
    B_pad = n_tiles * tm
    if B_pad != B:
        x = jnp.pad(x, ((0, B_pad - B), (0, 0)))

    tanh_dtype = jnp.bfloat16 if _supports_bf16_eup() else jnp.float32

    def resident(arr):
        # Same block every grid step -> stays VMEM-resident across steps.
        return pl.BlockSpec(arr.shape, lambda i: (0, 0))

    flops = 2 * B_pad * (d_in * d_hidden + 2 * d_hidden * d_hidden
                         + d_hidden * n_pad)
    transcendentals = B_pad * (3 * d_hidden + n_pad)
    bytes_accessed = (x.size * 4
                      + (w1.size + w2.size + w3.size + w4.size) * 2
                      + (b1.size + b2.size + b3.size + b4.size) * 4
                      + B_pad * n_pad * 4)

    out = pl.pallas_call(
        functools.partial(ffnet_kernel, tanh_dtype=tanh_dtype),
        out_shape=jax.ShapeDtypeStruct((B_pad, n_pad), jnp.float32),
        grid=(n_tiles,),
        in_specs=[
            pl.BlockSpec((tm, d_in), lambda i: (i, 0)),   # raw f32 x tile
            resident(w1), resident(b1),
            resident(w2), resident(b2),
            resident(w3), resident(b3),
            resident(w4), resident(b4),
        ],
        out_specs=pl.BlockSpec((tm, n_pad), lambda i: (i, 0)),
        compiler_params=pltpu.CompilerParams(
            dimension_semantics=("parallel",)),
        cost_estimate=pl.CostEstimate(
            flops=flops,
            transcendentals=transcendentals,
            bytes_accessed=bytes_accessed),
    )(x, w1, b1, w2, b2, w3, b3, w4, b4)

    return out[:B, :d_out]


def xavier_normal(key, fan_in, fan_out):
    # Matches torch.nn.init.xavier_normal_: std = sqrt(2 / (fan_in + fan_out)).
    std = (2.0 / (fan_in + fan_out)) ** 0.5
    return std * jax.random.normal(key, (fan_in, fan_out), dtype=jnp.float32)


def make_params(key, input_size=5 * 39, hidden_size=256, d_vector_size=8):
    # FFNet zeroes its biases explicitly (nn.init.constant_(bias, 0.0)).
    dims = [(input_size, hidden_size),
            (hidden_size, hidden_size),
            (hidden_size, hidden_size),
            (hidden_size, d_vector_size)]
    keys = jax.random.split(key, len(dims))
    params = []
    for k, (fi, fo) in zip(keys, dims):
        w = xavier_normal(k, fi, fo)
        b = jnp.zeros((1, fo), dtype=jnp.float32)  # 2D for clean VMEM layout
        params.append((w, b))
    return params


def ffnet_reference(x, params):
    # Pure-f32 reference matching the PyTorch module's forward.
    for w, b in params:
        x = jnp.tanh(x @ w + b)
    return x


if __name__ == "__main__":
    key = jax.random.PRNGKey(0)
    k_param, k_x1, k_x2 = jax.random.split(key, 3)

    input_size, hidden_size, d_vector_size = 5 * 39, 256, 8
    params = make_params(k_param, input_size, hidden_size, d_vector_size)
    prepped = prepare_params(params)          # one-time weight prep

    # Small serving-style batch (single tile, no batch padding loop waste).
    batch_small = 4
    x_small = jax.random.normal(k_x1, (batch_small, input_size),
                                dtype=jnp.float32)
    out_small = jax.block_until_ready(ffnet_forward(x_small, prepped))
    ref_small = ffnet_reference(x_small, params)
    assert out_small.shape == (batch_small, d_vector_size)
    # bf16 weights / activations (and bf16 tanh on v6e/v7x) vs f32 reference.
    assert jnp.allclose(out_small, ref_small, atol=5e-2, rtol=5e-2), (
        float(jnp.max(jnp.abs(out_small - ref_small))))

    # Larger, non-aligned batch: exercises balanced 2-tile grid + row padding.
    batch_big = 600
    x_big = jax.random.normal(k_x2, (batch_big, input_size),
                              dtype=jnp.float32)
    out_big = jax.block_until_ready(ffnet_forward(x_big, prepped))
    ref_big = ffnet_reference(x_big, params)
    assert out_big.shape == (batch_big, d_vector_size)
    assert jnp.allclose(out_big, ref_big, atol=5e-2, rtol=5e-2), (
        float(jnp.max(jnp.abs(out_big - ref_big))))

    print("KERNEL_OK")
</pallas_src>

<mosaic_0001>
module attributes {stable_mosaic.version = 11 : i64} {
  func.func @ffnet_kernel(%arg0: i32, %arg1: memref<8x195xf32, #tpu.memory_space<vmem>>, %arg2: memref<195x256xbf16, #tpu.memory_space<vmem>>, %arg3: memref<1x256xf32, #tpu.memory_space<vmem>>, %arg4: memref<256x256xbf16, #tpu.memory_space<vmem>>, %arg5: memref<1x256xf32, #tpu.memory_space<vmem>>, %arg6: memref<256x256xbf16, #tpu.memory_space<vmem>>, %arg7: memref<1x256xf32, #tpu.memory_space<vmem>>, %arg8: memref<256x128xbf16, #tpu.memory_space<vmem>>, %arg9: memref<1x128xf32, #tpu.memory_space<vmem>>, %arg10: memref<8x128xf32, #tpu.memory_space<vmem>>) attributes {dimension_semantics = [#tpu.dimension_semantics<parallel>], iteration_bounds = array<i64: 1>, scalar_prefetch = 0 : i64, scratch_operands = 0 : i64, tpu.core_type = #tpu.core_type<tc>, window_params = [{transform_indices = @transform_0, window_bounds = array<i64: 8, 195>}, {pipeline_mode = #tpu.pipeline_mode<synchronous>, transform_indices = @transform_1, window_bounds = array<i64: 195, 256>}, {pipeline_mode = #tpu.pipeline_mode<synchronous>, transform_indices = @transform_2, window_bounds = array<i64: 1, 256>}, {pipeline_mode = #tpu.pipeline_mode<synchronous>, transform_indices = @transform_3, window_bounds = array<i64: 256, 256>}, {pipeline_mode = #tpu.pipeline_mode<synchronous>, transform_indices = @transform_4, window_bounds = array<i64: 1, 256>}, {pipeline_mode = #tpu.pipeline_mode<synchronous>, transform_indices = @transform_5, window_bounds = array<i64: 256, 256>}, {pipeline_mode = #tpu.pipeline_mode<synchronous>, transform_indices = @transform_6, window_bounds = array<i64: 1, 256>}, {pipeline_mode = #tpu.pipeline_mode<synchronous>, transform_indices = @transform_7, window_bounds = array<i64: 256, 128>}, {pipeline_mode = #tpu.pipeline_mode<synchronous>, transform_indices = @transform_8, window_bounds = array<i64: 1, 128>}, {transform_indices = @transform_9, window_bounds = array<i64: 8, 128>}]} {
    %c0 = arith.constant 0 : index
    %c0_0 = arith.constant 0 : index
    %0 = vector.load %arg1[%c0, %c0_0] : memref<8x195xf32, #tpu.memory_space<vmem>>, vector<8x195xf32>
    %1 = arith.truncf %0 : vector<8x195xf32> to vector<8x195xbf16>
    %c0_1 = arith.constant 0 : index
    %c0_2 = arith.constant 0 : index
    %2 = vector.load %arg2[%c0_1, %c0_2] : memref<195x256xbf16, #tpu.memory_space<vmem>>, vector<195x256xbf16>
    %cst = arith.constant dense<0.000000e+00> : vector<8x256xf32>
    %3 = tpu.matmul %1, %2, %cst {dimension_numbers = #tpu.dot_dimension_numbers<[1], [0], [0], [1], [0, 0, 1, 1], [], []>} : vector<8x195xbf16>, vector<195x256xbf16>, vector<8x256xf32> -> vector<8x256xf32>
    %c0_3 = arith.constant 0 : index
    %c0_4 = arith.constant 0 : index
    %4 = vector.load %arg3[%c0_3, %c0_4] : memref<1x256xf32, #tpu.memory_space<vmem>>, vector<1x256xf32>
    %5 = vector.broadcast %4 : vector<1x256xf32> to vector<8x256xf32>
    %6 = arith.addf %3, %5 : vector<8x256xf32>
    %7 = arith.truncf %6 : vector<8x256xf32> to vector<8x256xbf16>
    %8 = math.tanh %7 : vector<8x256xbf16>
    %c0_5 = arith.constant 0 : index
    %c0_6 = arith.constant 0 : index
    %9 = vector.load %arg4[%c0_5, %c0_6] : memref<256x256xbf16, #tpu.memory_space<vmem>>, vector<256x256xbf16>
    %cst_7 = arith.constant dense<0.000000e+00> : vector<8x256xf32>
    %10 = tpu.matmul %8, %9, %cst_7 {dimension_numbers = #tpu.dot_dimension_numbers<[1], [0], [0], [1], [0, 0, 1, 1], [], []>} : vector<8x256xbf16>, vector<256x256xbf16>, vector<8x256xf32> -> vector<8x256xf32>
    %c0_8 = arith.constant 0 : index
    %c0_9 = arith.constant 0 : index
    %11 = vector.load %arg5[%c0_8, %c0_9] : memref<1x256xf32, #tpu.memory_space<vmem>>, vector<1x256xf32>
    %12 = vector.broadcast %11 : vector<1x256xf32> to vector<8x256xf32>
    %13 = arith.addf %10, %12 : vector<8x256xf32>
    %14 = arith.truncf %13 : vector<8x256xf32> to vector<8x256xbf16>
    %15 = math.tanh %14 : vector<8x256xbf16>
    %c0_10 = arith.constant 0 : index
    %c0_11 = arith.constant 0 : index
    %16 = vector.load %arg6[%c0_10, %c0_11] : memref<256x256xbf16, #tpu.memory_space<vmem>>, vector<256x256xbf16>
    %cst_12 = arith.constant dense<0.000000e+00> : vector<8x256xf32>
    %17 = tpu.matmul %15, %16, %cst_12 {dimension_numbers = #tpu.dot_dimension_numbers<[1], [0], [0], [1], [0, 0, 1, 1], [], []>} : vector<8x256xbf16>, vector<256x256xbf16>, vector<8x256xf32> -> vector<8x256xf32>
    %c0_13 = arith.constant 0 : index
    %c0_14 = arith.constant 0 : index
    %18 = vector.load %arg7[%c0_13, %c0_14] : memref<1x256xf32, #tpu.memory_space<vmem>>, vector<1x256xf32>
    %19 = vector.broadcast %18 : vector<1x256xf32> to vector<8x256xf32>
    %20 = arith.addf %17, %19 : vector<8x256xf32>
    %21 = arith.truncf %20 : vector<8x256xf32> to vector<8x256xbf16>
    %22 = math.tanh %21 : vector<8x256xbf16>
    %c0_15 = arith.constant 0 : index
    %c0_16 = arith.constant 0 : index
    %23 = vector.load %arg8[%c0_15, %c0_16] : memref<256x128xbf16, #tpu.memory_space<vmem>>, vector<256x128xbf16>
    %cst_17 = arith.constant dense<0.000000e+00> : vector<8x128xf32>
    %24 = tpu.matmul %22, %23, %cst_17 {dimension_numbers = #tpu.dot_dimension_numbers<[1], [0], [0], [1], [0, 0, 1, 1], [], []>} : vector<8x256xbf16>, vector<256x128xbf16>, vector<8x128xf32> -> vector<8x128xf32>
    %c0_18 = arith.constant 0 : index
    %c0_19 = arith.constant 0 : index
    %25 = vector.load %arg9[%c0_18, %c0_19] : memref<1x128xf32, #tpu.memory_space<vmem>>, vector<1x128xf32>
    %26 = vector.broadcast %25 : vector<1x128xf32> to vector<8x128xf32>
    %27 = arith.addf %24, %26 : vector<8x128xf32>
    %28 = arith.truncf %27 : vector<8x128xf32> to vector<8x128xbf16>
    %29 = math.tanh %28 : vector<8x128xbf16>
    %30 = arith.extf %29 : vector<8x128xbf16> to vector<8x128xf32>
    %c0_20 = arith.constant 0 : index
    %c0_21 = arith.constant 0 : index
    %31 = vector.load %arg10[%c0_20, %c0_21] : memref<8x128xf32, #tpu.memory_space<vmem>>, vector<8x128xf32>
    tpu.vector_store %arg10[%c0_20, %c0_21], %30 {strides = array<i32>} : memref<8x128xf32, #tpu.memory_space<vmem>>, vector<8x128xf32>,
    return
  }
  func.func @transform_0(%arg0: i32) -> (i32, i32) {
    %c0_i32 = arith.constant 0 : i32
    %c0_i32_0 = arith.constant 0 : i32
    return %arg0, %c0_i32 : i32, i32
  }
  func.func @transform_1(%arg0: i32) -> (i32, i32) {
    %c0_i32 = arith.constant 0 : i32
    %c0_i32_0 = arith.constant 0 : i32
    %c0_i32_1 = arith.constant 0 : i32
    return %c0_i32, %c0_i32_0 : i32, i32
  }
  func.func @transform_2(%arg0: i32) -> (i32, i32) {
    %c0_i32 = arith.constant 0 : i32
    %c0_i32_0 = arith.constant 0 : i32
    %c0_i32_1 = arith.constant 0 : i32
    return %c0_i32, %c0_i32_0 : i32, i32
  }
  func.func @transform_3(%arg0: i32) -> (i32, i32) {
    %c0_i32 = arith.constant 0 : i32
    %c0_i32_0 = arith.constant 0 : i32
    %c0_i32_1 = arith.constant 0 : i32
    return %c0_i32, %c0_i32_0 : i32, i32
  }
  func.func @transform_4(%arg0: i32) -> (i32, i32) {
    %c0_i32 = arith.constant 0 : i32
    %c0_i32_0 = arith.constant 0 : i32
    %c0_i32_1 = arith.constant 0 : i32
    return %c0_i32, %c0_i32_0 : i32, i32
  }
  func.func @transform_5(%arg0: i32) -> (i32, i32) {
    %c0_i32 = arith.constant 0 : i32
    %c0_i32_0 = arith.constant 0 : i32
    %c0_i32_1 = arith.constant 0 : i32
    return %c0_i32, %c0_i32_0 : i32, i32
  }
  func.func @transform_6(%arg0: i32) -> (i32, i32) {
    %c0_i32 = arith.constant 0 : i32
    %c0_i32_0 = arith.constant 0 : i32
    %c0_i32_1 = arith.constant 0 : i32
    return %c0_i32, %c0_i32_0 : i32, i32
  }
  func.func @transform_7(%arg0: i32) -> (i32, i32) {
    %c0_i32 = arith.constant 0 : i32
    %c0_i32_0 = arith.constant 0 : i32
    %c0_i32_1 = arith.constant 0 : i32
    return %c0_i32, %c0_i32_0 : i32, i32
  }
  func.func @transform_8(%arg0: i32) -> (i32, i32) {
    %c0_i32 = arith.constant 0 : i32
    %c0_i32_0 = arith.constant 0 : i32
    %c0_i32_1 = arith.constant 0 : i32
    return %c0_i32, %c0_i32_0 : i32, i32
  }
  func.func @transform_9(%arg0: i32) -> (i32, i32) {
    %c0_i32 = arith.constant 0 : i32
    %c0_i32_0 = arith.constant 0 : i32
    return %arg0, %c0_i32 : i32, i32
  }
}

</mosaic_0001>

<bundles_post_ra>
// kernel: tpu_custom_call.1
= control target key start
LH: loop header
LB: loop body
LE: loop exit
PB: predicated region body
PF: predicated region fallthrough
CT: control target
= control target key end

     0   :  { %14 = vsyncpa [#allocation3], 0  ;;  %s1889_s0 = inlined_call_operand.hbm [shape: f32[8,195], index: 0, kind: input, shape index: {}]   ;;  %s1890_s1 = inlined_call_operand.hbm [shape: bf16[195,256], index: 1, kind: input, shape index: {}]   ;;  %s1891_s2 = inlined_call_operand.hbm [shape: f32[1,256], index: 2, kind: input, shape index: {}]   ;;  %s1892_s3 = inlined_call_operand.hbm [shape: bf16[256,256], index: 3, kind: input, shape index: {}]   ;;  %s1893_s4 = inlined_call_operand.vmem [shape: f32[1,256], index: 4, kind: input, shape index: {}]   ;;  %s1894_s5 = inlined_call_operand.hbm [shape: bf16[256,256], index: 5, kind: input, shape index: {}]   ;;  %s1895_s6 = inlined_call_operand.vmem [shape: f32[1,256], index: 6, kind: input, shape index: {}]   ;;  %s1896_s7 = inlined_call_operand.hbm [shape: bf16[256,128], index: 7, kind: input, shape index: {}]   ;;  %s1897_s8 = inlined_call_operand.vmem [shape: f32[1,128], index: 8, kind: input, shape index: {}]   ;;  %s1898_s9 = inlined_call_operand.hbm [shape: f32[8,128], index: 9, kind: output, shape index: {}]  }
   0x1   :  { %15 = vsyncpa [#allocation6], 0 }
   0x2   :  { %16 = vsyncpa [#allocation9], 0 }
   0x3   :  { %17 = vsyncpa [#allocation12], 0  ;;  %s34_s11 = sshll.u32 %s1890_s1, 4  ;;  %s35_s11 = int_to_ptr.hbm [resolvable:$true] %s34_s11 }
   0x4   :  { %18 = vsyncpa [#allocation4], 0  ;;  %s1785_s12 = smov [#allocation5]   ;;  %s58_s16 = sshll.u32 %s1892_s3, 4  ;;  %s59_s16 = int_to_ptr.hbm [resolvable:$true] %s58_s16 }
   0x5   :  { %s36_s13 = sshll.u32 %s1785_s12, 4  ;;  %s1786_s17 = smov 128   ;;  %s37_s13 = int_to_ptr.vmem [resolvable:$true] %s36_s13 }
   0x6   :  { %s1787_s18 = smov 8   ;;  %s1788_s19 = smov [#allocation8]  }
   0x7   :  { %42 = dma.hbm_to_vmem [thread:$0]  %s35_s11, 3200, %s37_s13, [#allocation6], %s1786_s17, %s1786_s17, %s1787_s18  }
   0x8   :  { %s60_s20 = sshll.u32 %s1788_s19, 4  ;;  %s24_s22 = sshll.u32 %s1889_s0, 4  ;;  %s61_s20 = int_to_ptr.vmem [resolvable:$true] %s60_s20  ;;  %s25_s22 = int_to_ptr.hbm [resolvable:$true] %s24_s22 }
   0x9   :  { %66 = dma.hbm_to_vmem [thread:$0]  %s59_s16, 4096, %s61_s20, [#allocation9], %s1786_s17, %s1786_s17, %s1787_s18  }
   0xa   :  { %s48_s24 = sshll.u32 %s1891_s2, 4  ;;  %s1789_s25 = smov [#allocation2]   ;;  %s49_s24 = int_to_ptr.hbm [resolvable:$true] %s48_s24 }
   0xb   :  { %s26_s26 = sshll.u32 %s1789_s25, 4  ;;  %s1790_s27 = smov [#allocation7]   ;;  %s27_s26 = int_to_ptr.vmem [resolvable:$true] %s26_s26 }
   0xc   :  { %29 = dma.hbm_to_vmem [thread:$0]  %s25_s22, 256, %s27_s26, [#allocation3]  }
   0xd   :  { %s50_s28 = sshll.u32 %s1790_s27, 4  ;;  %s73_s0 = sshll.u32 %s1894_s5, 4  ;;  %s51_s28 = int_to_ptr.vmem [resolvable:$true] %s50_s28  ;;  %s74_s0 = int_to_ptr.hbm [resolvable:$true] %s73_s0 }
   0xe   :  { %53 = dma.hbm_to_vmem [thread:$0]  %s49_s24, 32, %s51_s28, [#allocation6]  }
   0xf   :  { %s88_s12 = sshll.u32 %s1896_s7, 4  ;;  %s1791_s13 = smov [#allocation10]   ;;  %s89_s12 = int_to_ptr.hbm [resolvable:$true] %s88_s12 }
  0x10   :  { %s75_s2 = sshll.u32 %s1791_s13, 4  ;;  %s1792_s14 = smov [#allocation11]   ;;  %s76_s2 = int_to_ptr.vmem [resolvable:$true] %s75_s2 }
  0x11   :  { %81 = dma.hbm_to_vmem [thread:$0]  %s74_s0, 4096, %s76_s2, [#allocation9], %s1786_s17, %s1786_s17, %s1787_s18  }
  0x12   :  { %s90_s15 = sshll.u32 %s1792_s14, 4  ;;  %s1793_s16 = smov 64   ;;  %s91_s15 = int_to_ptr.vmem [resolvable:$true] %s90_s15 }
  0x13   :  { %s1794_s5 = smov 4  }
  0x14   :  { %96 = dma.hbm_to_vmem [thread:$0]  %s89_s12, 2048, %s91_s15, [#allocation12], %s1793_s16, %s1793_s16, %s1794_s5  }
  0x15   :  { %1775 = dma.done.wait [#allocation3], 256  }
  0x16   :  { %1776 = vsyncadd [#allocation3], 4294967040 }
  0x17   :  { %1777 = dma.done.wait [#allocation6], 3232  }
  0x18   :  { %1778 = vsyncadd [#allocation6], 4294964064 }
  0x19   :  { %1779 = dma.done.wait [#allocation9], 8192  }
  0x1a   :  { %1780 = vsyncadd [#allocation9], 4294959104 }
  0x1b   :  { %1781 = dma.done.wait [#allocation12], 2048  }
  0x1c   :  { %1782 = vsyncadd [#allocation12], 4294965248  ;;  %vm288_vm0 = vcmask 1040384   ;;  %vm289_vm1 = vcmask 1041408   ;;  %v1795_v0 = vmov 65535   ;;  %vm284_vm2 = vcmask 547840  }
  0x1d   :  { %v290_v1 = vsel %vm288_vm0, 4294967295, %v1795_v0  ;;  %v1490_v2 = vld [vmem:[#allocation5 + $0x74] sm:$0xf]  ;;  %v1118_v3 = vld [vmem:[#allocation5 + $0x78] sm:$0xf0]  ;;  %s1796_s20 = smov [#allocation13]  }
  0x1e   :  { %v1116_v4 = vld [vmem:[#allocation5 + $0x70] sm:$0xf]  ;;  %v1121_v5 = vor.u32 %v1490_v2, %v1118_v3  ;;  %v1491_v6 = vld [vmem:[#allocation5 + $0x74] sm:$0xf0]  ;;  %v1488_v7 = vld [vmem:[#allocation5 + $0x64] sm:$0xf] }
  0x1f   :  { %v1110_v8 = vld [vmem:[#allocation5 + $0x68] sm:$0xf0]  ;;  %v1117_v9 = vor.u32 %v1491_v6, %v1116_v4  ;;  %v1108_v10 = vld [vmem:[#allocation5 + $0x60] sm:$0xf]  ;;  %v1489_v11 = vld [vmem:[#allocation5 + $0x64] sm:$0xf0] }
  0x20   :  { %v152_v12 = vld [vmem:[#allocation5 + $0xc0] sm:$0x33]  ;;  %324 = vmatpush.bf16.msra.mxu2 %v1121_v5  ;;  %v1113_v13 = vor.u32 %v1488_v7, %v1110_v8  ;;  %v1109_v16 = vor.u32 %v1489_v11, %v1108_v10  ;;  %v291_v17 = vsel %vm289_vm1, %v290_v1, 0  ;;  %v1486_v18 = vld [vmem:[#allocation5 + $0x54] sm:$0xf]  ;;  %v125_v11 = vld [vmem:[#allocation2 + $0x8] sm:$0xff] }
  0x21   :  { %v233_v14 = vunpack.c.h.b16 %v152_v12  ;;  %v232_v15 = vunpack.c.l.b16 %v152_v12  ;;  %298 = vmatpush.bf16.msra.mxu0 %v1117_v9  ;;  %v1102_v19 = vld [vmem:[#allocation5 + $0x58] sm:$0xf0]  ;;  %v1100_v21 = vld [vmem:[#allocation5 + $0x50] sm:$0xf]  ;;  %v1487_v22 = vld [vmem:[#allocation5 + $0x54] sm:$0xf0] }
  0x22   :  { %v1498_v24 = vld [vmem:[#allocation5 + $0xb4] sm:$0xf]  ;;  %v1150_v25 = vld [vmem:[#allocation5 + $0xb8] sm:$0xf0]  ;;  %v1105_v27 = vor.u32 %v1486_v18, %v1102_v19  ;;  %v1101_v29 = vor.u32 %v1487_v22, %v1100_v21  ;;  %v1484_v30 = vld [vmem:[#allocation5 + $0x44] sm:$0xf]  ;;  %v127_v22 = vpack.c.bf16 %v125_v11, %v125_v11 }
  0x23   :  { %v259_v20 = vpack.c.b16 %v233_v14, %v233_v14  ;;  %v258_v23 = vpack.c.b16 %v232_v15, %v232_v15  ;;  %v1094_v31 = vld [vmem:[#allocation5 + $0x48] sm:$0xf0]  ;;  %v1092_v32 = vld [vmem:[#allocation5 + $0x40] sm:$0xf]  ;;  %v1153_v33 = vor.u32 %v1498_v24, %v1150_v25  ;;  %v1485_v34 = vld [vmem:[#allocation5 + $0x44] sm:$0xf0] }
  0x24   :  { %325 = vmatpush.bf16.msra.mxu2 %v1113_v13  ;;  %v1148_v35 = vld [vmem:[#allocation5 + $0xb0] sm:$0xf]  ;;  %v1499_v36 = vld [vmem:[#allocation5 + $0xb4] sm:$0xf0]  ;;  %v1496_v37 = vld [vmem:[#allocation5 + $0xa4] sm:$0xf]  ;;  %v1097_v40 = vor.u32 %v1484_v30, %v1094_v31  ;;  %v1093_v42 = vor.u32 %v1485_v34, %v1092_v32 }
  0x25   :  { %v296_v26 = vand.u32 %v291_v17, %v259_v20  ;;  %v293_v28 = vand.u32 %v291_v17, %v258_v23  ;;  %299 = vmatpush.bf16.msra.mxu0 %v1109_v16  ;;  %v1142_v38 = vld [vmem:[#allocation5 + $0xa8] sm:$0xf0]  ;;  %v1149_v39 = vor.u32 %v1499_v36, %v1148_v35  ;;  %v1140_v41 = vld [vmem:[#allocation5 + $0xa0] sm:$0xf]  ;;  %v1482_v43 = vld [vmem:[#allocation5 + $0x34] sm:$0xf] }
  0x26   :  { %v1086_v44 = vld [vmem:[#allocation5 + $0x38] sm:$0xf0]  ;;  %v1497_v45 = vld [vmem:[#allocation5 + $0xa4] sm:$0xf0]  ;;  %v1145_v46 = vor.u32 %v1496_v37, %v1142_v38  ;;  %v1084_v47 = vld [vmem:[#allocation5 + $0x30] sm:$0xf] }
  0x27   :  { %340 = vmatpush.bf16.msra.mxu3 %v296_v26  ;;  %314 = vmatpush.bf16.msra.mxu1 %v293_v28  ;;  %v1483_v48 = vld [vmem:[#allocation5 + $0x34] sm:$0xf0]  ;;  %v1494_v49 = vld [vmem:[#allocation5 + $0x94] sm:$0xf]  ;;  %v1141_v50 = vor.u32 %v1497_v45, %v1140_v41  ;;  %v1134_v51 = vld [vmem:[#allocation5 + $0x98] sm:$0xf0]  ;;  %v1089_v54 = vor.u32 %v1482_v43, %v1086_v44 }
  0x28   :  { %326 = vmatpush.bf16.msra.mxu2 %v1105_v27  ;;  %v1132_v52 = vld [vmem:[#allocation5 + $0x90] sm:$0xf]  ;;  %v1495_v53 = vld [vmem:[#allocation5 + $0x94] sm:$0xf0]  ;;  %v1085_v55 = vor.u32 %v1483_v48, %v1084_v47  ;;  %v1480_v56 = vld [vmem:[#allocation5 + $0x24] sm:$0xf]  ;;  %v1137_v59 = vor.u32 %v1494_v49, %v1134_v51 }
  0x29   :  { %300 = vmatpush.bf16.msra.mxu0 %v1101_v29  ;;  %v1078_v57 = vld [vmem:[#allocation5 + $0x28] sm:$0xf0]  ;;  %v1076_v58 = vld [vmem:[#allocation5 + $0x20] sm:$0xf]  ;;  %v1481_v60 = vld [vmem:[#allocation5 + $0x24] sm:$0xf0]  ;;  %v1133_v63 = vor.u32 %v1495_v53, %v1132_v52 }
  0x2a   :  { %v1492_v61 = vld [vmem:[#allocation5 + $0x84] sm:$0xf]  ;;  %v1126_v62 = vld [vmem:[#allocation5 + $0x88] sm:$0xf0]  ;;  %v1124_v0 = vld [vmem:[#allocation5 + $0x80] sm:$0xf]  ;;  %v1081_v3 = vor.u32 %v1480_v56, %v1078_v57  ;;  %v1077_v7 = vor.u32 %v1481_v60, %v1076_v58 }
  0x2b   :  { %341 = vmatpush.bf16.msra.mxu3 %v1153_v33  ;;  %315 = vmatpush.bf16.msra.mxu1 %v1149_v39  ;;  %v1493_v1 = vld [vmem:[#allocation5 + $0x84] sm:$0xf0]  ;;  %v1214_v2 = vld [vmem:[#allocation8 + $0x70] sm:$0xf]  ;;  %v1515_v4 = vld [vmem:[#allocation8 + $0x74] sm:$0xf0]  ;;  %v1129_v10 = vor.u32 %v1492_v61, %v1126_v62 }
  0x2c   :  { %327 = vmatpush.bf16.msra.mxu2 %v1097_v40  ;;  %v1278_v5 = vld [vmem:[#allocation8 + $0xf0] sm:$0xf]  ;;  %v1531_v6 = vld [vmem:[#allocation8 + $0xf4] sm:$0xf0]  ;;  %v1478_v8 = vld [vmem:[#allocation5 + $0x14] sm:$0xf]  ;;  %v1125_v14 = vor.u32 %v1493_v1, %v1124_v0  ;;  %v1215_v15 = vor.u32 %v1515_v4, %v1214_v2 }
  0x2d   :  { %301 = vmatpush.bf16.msra.mxu0 %v1093_v42  ;;  %v1070_v9 = vld [vmem:[#allocation5 + $0x18] sm:$0xf0]  ;;  %v1068_v12 = vld [vmem:[#allocation5 + $0x10] sm:$0xf]  ;;  %v1479_v13 = vld [vmem:[#allocation5 + $0x14] sm:$0xf0]  ;;  %v1279_v18 = vor.u32 %v1531_v6, %v1278_v5 }
  0x2e   :  { %v1206_v16 = vld [vmem:[#allocation8 + $0x60] sm:$0xf]  ;;  %v1513_v17 = vld [vmem:[#allocation8 + $0x64] sm:$0xf0]  ;;  %v1073_v19 = vor.u32 %v1478_v8, %v1070_v9  ;;  %v1069_v23 = vor.u32 %v1479_v13, %v1068_v12  ;;  %v1476_v24 = vld [vmem:[#allocation5 + $0x4] sm:$0xf] }
  0x2f   :  { %342 = vmatpush.bf16.msra.mxu3 %v1145_v46  ;;  %316 = vmatpush.bf16.msra.mxu1 %v1141_v50  ;;  %v1270_v20 = vld [vmem:[#allocation8 + $0xe0] sm:$0xf]  ;;  %v1529_v21 = vld [vmem:[#allocation8 + $0xe4] sm:$0xf0]  ;;  %v1060_v26 = vld [vmem:[#allocation5] sm:$0xf]  ;;  %v1207_v32 = vor.u32 %v1513_v17, %v1206_v16 }
  0x30   :  { %328 = vmatpush.bf16.msra.mxu2 %v1089_v54  ;;  %v1062_v25 = vld [vmem:[#allocation5 + $0x8] sm:$0xf0]  ;;  %v1477_v27 = vld [vmem:[#allocation5 + $0x4] sm:$0xf0]  ;;  %v1530_v28 = vld [vmem:[#allocation8 + $0xf4] sm:$0xf]  ;;  %v1271_v33 = vor.u32 %v1529_v21, %v1270_v20 }
  0x31   :  { %302 = vmatpush.bf16.msra.mxu0 %v1085_v55  ;;  %v1280_v29 = vld [vmem:[#allocation8 + $0xf8] sm:$0xf0]  ;;  %v1514_v30 = vld [vmem:[#allocation8 + $0x74] sm:$0xf]  ;;  %v1065_v34 = vor.u32 %v1476_v24, %v1062_v25  ;;  %v124_v35 = vld [vmem:[#allocation2] sm:$0xff]  ;;  %v1061_v38 = vor.u32 %v1477_v27, %v1060_v26  ;;  %s1043_s21 = sshll.u32 %s1796_s20, 4  ;;  %s1044_s21 = int_to_ptr.vmem [resolvable:$true] %s1043_s21 }
  0x32   :  { %v1216_v31 = vld [vmem:[#allocation8 + $0x78] sm:$0xf0]  ;;  %v1198_v36 = vld [vmem:[#allocation8 + $0x50] sm:$0xf]  ;;  %v1511_v37 = vld [vmem:[#allocation8 + $0x54] sm:$0xf0]  ;;  %v1283_v39 = vor.u32 %v1530_v28, %v1280_v29  ;;  %v126_v43 = vpack.c.bf16 %v124_v35, %v124_v35 }
  0x33   :  { %343 = vmatpush.bf16.msra.mxu3 %v1137_v59  ;;  %317 = vmatpush.bf16.msra.mxu1 %v1133_v63  ;;  %v1219_v40 = vor.u32 %v1514_v30, %v1216_v31  ;;  %v1528_v41 = vld [vmem:[#allocation8 + $0xe4] sm:$0xf]  ;;  %v1272_v42 = vld [vmem:[#allocation8 + $0xe8] sm:$0xf0]  ;;  %v1199_v46 = vor.u32 %v1511_v37, %v1198_v36  ;;  %v1510_v49 = vld [vmem:[#allocation8 + $0x54] sm:$0xf] }
  0x34   :  { %329 = vmatpush.bf16.msra.mxu2 %v1081_v3  ;;  %v1512_v44 = vld [vmem:[#allocation8 + $0x64] sm:$0xf]  ;;  %v1208_v45 = vld [vmem:[#allocation8 + $0x68] sm:$0xf0]  ;;  %v1275_v47 = vor.u32 %v1528_v41, %v1272_v42  ;;  %v1200_v50 = vld [vmem:[#allocation8 + $0x58] sm:$0xf0] }
  0x35   :  { %303 = vmatpush.bf16.msra.mxu0 %v1077_v7  ;;  %v1211_v48 = vor.u32 %v1512_v44, %v1208_v45  ;;  %v1203_v51 = vor.u32 %v1510_v49, %v1200_v50  ;;  %v1190_v52 = vld [vmem:[#allocation8 + $0x40] sm:$0xf]  ;;  %v1509_v53 = vld [vmem:[#allocation8 + $0x44] sm:$0xf0]  ;;  %v1262_v54 = vld [vmem:[#allocation8 + $0xd0] sm:$0xf] }
  0x36   :  { %v1191_v55 = vor.u32 %v1509_v53, %v1190_v52  ;;  %v1527_v56 = vld [vmem:[#allocation8 + $0xd4] sm:$0xf0]  ;;  %v1508_v57 = vld [vmem:[#allocation8 + $0x44] sm:$0xf]  ;;  %v1192_v58 = vld [vmem:[#allocation8 + $0x48] sm:$0xf0] }
  0x37   :  { %344 = vmatpush.bf16.msra.mxu3 %v1129_v10  ;;  %318 = vmatpush.bf16.msra.mxu1 %v1125_v14  ;;  %v1263_v59 = vor.u32 %v1527_v56, %v1262_v54  ;;  %v1195_v60 = vor.u32 %v1508_v57, %v1192_v58  ;;  %v1526_v61 = vld [vmem:[#allocation8 + $0xd4] sm:$0xf]  ;;  %v1264_v62 = vld [vmem:[#allocation8 + $0xd8] sm:$0xf0]  ;;  %v1182_v0 = vld [vmem:[#allocation8 + $0x30] sm:$0xf] }
  0x38   :  { %330 = vmatpush.bf16.msra.mxu2 %v1073_v19  ;;  %v1267_v63 = vor.u32 %v1526_v61, %v1264_v62  ;;  %v1507_v1 = vld [vmem:[#allocation8 + $0x34] sm:$0xf0]  ;;  %v1254_v2 = vld [vmem:[#allocation8 + $0xc0] sm:$0xf]  ;;  %v1525_v4 = vld [vmem:[#allocation8 + $0xc4] sm:$0xf0] }
  0x39   :  { %304 = vmatpush.bf16.msra.mxu0 %v1069_v23  ;;  %v1183_v3 = vor.u32 %v1507_v1, %v1182_v0  ;;  %v1506_v5 = vld [vmem:[#allocation8 + $0x34] sm:$0xf]  ;;  %v1184_v6 = vld [vmem:[#allocation8 + $0x38] sm:$0xf0]  ;;  %v1255_v7 = vor.u32 %v1525_v4, %v1254_v2  ;;  %v1524_v9 = vld [vmem:[#allocation8 + $0xc4] sm:$0xf] }
  0x3a   :  { %1155 = vmatmul.msk.bf16.vlgmr.msra.gmra.mxu3 %vm284_vm2, %v127_v22  ;;  %1154 = vmatmul.msk.bf16.vlgmr.msra.gmra.mxu1 %vm284_vm2, %v127_v22  ;;  %v1187_v8 = vor.u32 %v1506_v5, %v1184_v6  ;;  %v1256_v10 = vld [vmem:[#allocation8 + $0xc8] sm:$0xf0]  ;;  %v1174_v12 = vld [vmem:[#allocation8 + $0x20] sm:$0xf]  ;;  %v1505_v13 = vld [vmem:[#allocation8 + $0x24] sm:$0xf0] }
  0x3b   :  { %556 = vmatpush.bf16.msrb.mxu1 %v1215_v15  ;;  %569 = vmatpush.bf16.msrb.mxu3 %v1279_v18  ;;  %v1259_v11 = vor.u32 %v1524_v9, %v1256_v10  ;;  %v1246_v14 = vld [vmem:[#allocation8 + $0xb0] sm:$0xf]  ;;  %v1175_v15 = vor.u32 %v1505_v13, %v1174_v12  ;;  %v1523_v16 = vld [vmem:[#allocation8 + $0xb4] sm:$0xf0]  ;;  %v1504_v17 = vld [vmem:[#allocation8 + $0x24] sm:$0xf] }
  0x3c   :  { %331 = vmatpush.bf16.msra.mxu2 %v1065_v34  ;;  %v1176_v18 = vld [vmem:[#allocation8 + $0x28] sm:$0xf0]  ;;  %v1247_v19 = vor.u32 %v1523_v16, %v1246_v14  ;;  %v1522_v21 = vld [vmem:[#allocation8 + $0xb4] sm:$0xf]  ;;  %v1248_v22 = vld [vmem:[#allocation8 + $0xb8] sm:$0xf0] }
  0x3d   :  { %305 = vmatpush.bf16.msra.mxu0 %v1061_v38  ;;  %v1179_v20 = vor.u32 %v1504_v17, %v1176_v18  ;;  %v1251_v23 = vor.u32 %v1522_v21, %v1248_v22  ;;  %v1166_v24 = vld [vmem:[#allocation8 + $0x10] sm:$0xf]  ;;  %v1503_v25 = vld [vmem:[#allocation8 + $0x14] sm:$0xf0]  ;;  %v1238_v26 = vld [vmem:[#allocation8 + $0xa0] sm:$0xf] }
  0x3e   :  { %v1167_v27 = vor.u32 %v1503_v25, %v1166_v24  ;;  %v1521_v28 = vld [vmem:[#allocation8 + $0xa4] sm:$0xf0]  ;;  %v1502_v29 = vld [vmem:[#allocation8 + $0x14] sm:$0xf]  ;;  %v1168_v30 = vld [vmem:[#allocation8 + $0x18] sm:$0xf0] }
  0x3f   :  { %557 = vmatpush.bf16.msrb.mxu1 %v1207_v32  ;;  %570 = vmatpush.bf16.msrb.mxu3 %v1271_v33  ;;  %v1239_v31 = vor.u32 %v1521_v28, %v1238_v26  ;;  %v1171_v32 = vor.u32 %v1502_v29, %v1168_v30  ;;  %v1520_v33 = vld [vmem:[#allocation8 + $0xa4] sm:$0xf]  ;;  %v1240_v34 = vld [vmem:[#allocation8 + $0xa8] sm:$0xf0]  ;;  %v1158_v36 = vld [vmem:[#allocation8] sm:$0xf] }
  0x40   :  { %595 = vmatpush.bf16.msrb.mxu2 %v1283_v39  ;;  %306 = vmatmul.bf16.vlgmr.msra.gmra.mxu0 %v126_v43  ;;  %v1243_v35 = vor.u32 %v1520_v33, %v1240_v34  ;;  %v1501_v37 = vld [vmem:[#allocation8 + $0x4] sm:$0xf0]  ;;  %v1230_v38 = vld [vmem:[#allocation8 + $0x90] sm:$0xf]  ;;  %v1500_v41 = vld [vmem:[#allocation8 + $0x4] sm:$0xf] }
  0x41   :  { %582 = vmatpush.bf16.msrb.mxu0 %v1219_v40  ;;  %332 = vmatmul.bf16.vlgmr.msra.gmra.mxu2 %v126_v43  ;;  %v1159_v39 = vor.u32 %v1501_v37, %v1158_v36  ;;  %v1519_v40 = vld [vmem:[#allocation8 + $0x94] sm:$0xf0]  ;;  %v1160_v42 = vld [vmem:[#allocation8 + $0x8] sm:$0xf0]  ;;  %v1518_v45 = vld [vmem:[#allocation8 + $0x94] sm:$0xf] }
  0x42   :  { %v1231_v43 = vor.u32 %v1519_v40, %v1230_v38  ;;  %v1163_v44 = vor.u32 %v1500_v41, %v1160_v42  ;;  %v1517_v49 = vld [vmem:[#allocation8 + $0x84] sm:$0xf0]  ;;  %v1516_v50 = vld [vmem:[#allocation8 + $0x84] sm:$0xf]  ;;  %v1224_v52 = vld [vmem:[#allocation8 + $0x88] sm:$0xf0] }
  0x43   :  { %558 = vmatpush.bf16.msrb.mxu1 %v1199_v46  ;;  %571 = vmatpush.bf16.msrb.mxu3 %v1263_v59  ;;  %v1232_v46 = vld [vmem:[#allocation8 + $0x98] sm:$0xf0]  ;;  %v1227_v53 = vor.u32 %v1516_v50, %v1224_v52  ;;  %v1342_v54 = vld [vmem:[#allocation10 + $0x70] sm:$0xf]  ;;  %v1563_v59 = vld [vmem:[#allocation10 + $0xf4] sm:$0xf0] }
  0x44   :  { %596 = vmatpush.bf16.msrb.mxu2 %v1275_v47  ;;  %v1235_v47 = vor.u32 %v1518_v45, %v1232_v46  ;;  %v1406_v56 = vld [vmem:[#allocation10 + $0xf0] sm:$0xf]  ;;  %v153_v57 = vld [vmem:[#allocation7] sm:$0x3]  ;;  %v1562_v0 = vld [vmem:[#allocation10 + $0xf4] sm:$0xf] }
  0x45   :  { %583 = vmatpush.bf16.msrb.mxu0 %v1211_v48  ;;  %v1222_v48 = vld [vmem:[#allocation8 + $0x80] sm:$0xf]  ;;  %v1344_v61 = vld [vmem:[#allocation10 + $0x78] sm:$0xf0]  ;;  %v1407_v62 = vor.u32 %v1563_v59, %v1406_v56  ;;  %v1545_v5 = vld [vmem:[#allocation10 + $0x64] sm:$0xf0] }
  0x46   :  { %v1408_v1 = vld [vmem:[#allocation10 + $0xf8] sm:$0xf0]  ;;  %v1334_v2 = vld [vmem:[#allocation10 + $0x60] sm:$0xf]  ;;  %v1544_v10 = vld [vmem:[#allocation10 + $0x64] sm:$0xf] }
  0x47   :  { %559 = vmatpush.bf16.msrb.mxu1 %v1191_v55  ;;  %572 = vmatpush.bf16.msrb.mxu3 %v1255_v7  ;;  %v1547_v55 = vld [vmem:[#allocation10 + $0x74] sm:$0xf0]  ;;  %v1411_v4 = vor.u32 %v1562_v0, %v1408_v1  ;;  %v1398_v6 = vld [vmem:[#allocation10 + $0xe0] sm:$0xf]  ;;  %v1561_v7 = vld [vmem:[#allocation10 + $0xe4] sm:$0xf0] }
  0x48   :  { %597 = vmatpush.bf16.msrb.mxu2 %v1267_v63  ;;  %v1343_v58 = vor.u32 %v1547_v55, %v1342_v54  ;;  %v1399_v9 = vor.u32 %v1561_v7, %v1398_v6  ;;  %v1560_v12 = vld [vmem:[#allocation10 + $0xe4] sm:$0xf]  ;;  %v1400_v14 = vld [vmem:[#allocation10 + $0xe8] sm:$0xf0]  ;;  %v1326_v37 = vld [vmem:[#allocation10 + $0x50] sm:$0xf] }
  0x49   :  { %584 = vmatpush.bf16.msrb.mxu0 %v1203_v51  ;;  %v1223_v51 = vor.u32 %v1517_v49, %v1222_v48  ;;  %v1403_v16 = vor.u32 %v1560_v12, %v1400_v14  ;;  %v1543_v38 = vld [vmem:[#allocation10 + $0x54] sm:$0xf0]  ;;  %v1390_v40 = vld [vmem:[#allocation10 + $0xd0] sm:$0xf]  ;;  %v1542_v42 = vld [vmem:[#allocation10 + $0x54] sm:$0xf] }
  0x4a   :  { %v1559_v41 = vld [vmem:[#allocation10 + $0xd4] sm:$0xf0]  ;;  %v1558_v45 = vld [vmem:[#allocation10 + $0xd4] sm:$0xf]  ;;  %v1392_v46 = vld [vmem:[#allocation10 + $0xd8] sm:$0xf0] }
  0x4b   :  { %560 = vmatpush.bf16.msrb.mxu1 %v1183_v3  ;;  %573 = vmatpush.bf16.msrb.mxu3 %v1247_v19  ;;  %v1395_v48 = vor.u32 %v1558_v45, %v1392_v46  ;;  %v1318_v49 = vld [vmem:[#allocation10 + $0x40] sm:$0xf]  ;;  %v1541_v50 = vld [vmem:[#allocation10 + $0x44] sm:$0xf0]  ;;  %v1540_v54 = vld [vmem:[#allocation10 + $0x44] sm:$0xf] }
  0x4c   :  { %598 = vmatpush.bf16.msrb.mxu2 %v1259_v11  ;;  %v1336_v11 = vld [vmem:[#allocation10 + $0x68] sm:$0xf0]  ;;  %v1319_v52 = vor.u32 %v1541_v50, %v1318_v49  ;;  %v1555_v1 = vld [vmem:[#allocation10 + $0xb4] sm:$0xf0]  ;;  %v1554_v6 = vld [vmem:[#allocation10 + $0xb4] sm:$0xf] }
  0x4d   :  { %585 = vmatpush.bf16.msrb.mxu0 %v1195_v60  ;;  %v1546_v60 = vld [vmem:[#allocation10 + $0x74] sm:$0xf]  ;;  %v1339_v13 = vor.u32 %v1544_v10, %v1336_v11  ;;  %v1320_v55 = vld [vmem:[#allocation10 + $0x48] sm:$0xf0]  ;;  %v1376_v7 = vld [vmem:[#allocation10 + $0xb8] sm:$0xf0] }
  0x4e   :  { %v1347_v63 = vor.u32 %v1546_v60, %v1344_v61  ;;  %v1384_v59 = vld [vmem:[#allocation10 + $0xc8] sm:$0xf0]  ;;  %v1310_v61 = vld [vmem:[#allocation10 + $0x30] sm:$0xf]  ;;  %v1537_v10 = vld [vmem:[#allocation10 + $0x24] sm:$0xf0] }
  0x4f   :  { %561 = vmatpush.bf16.msrb.mxu1 %v1175_v15  ;;  %574 = vmatpush.bf16.msrb.mxu3 %v1239_v31  ;;  %v155_v15 = vperm.slane %v153_v57, 0  ;;  %v1366_v11 = vld [vmem:[#allocation10 + $0xa0] sm:$0xf]  ;;  %v1536_v14 = vld [vmem:[#allocation10 + $0x24] sm:$0xf]  ;;  %v1571_v45 = vld [vmem:[#allocation11 + $0x38] sm:$0xff] }
  0x50   :  { %599 = vmatpush.bf16.msrb.mxu2 %v1251_v23  ;;  %v1579_v46 = vld [vmem:[#allocation11 + $0x78] sm:$0xff]  ;;  %s1045_s3 = sshll.u32 %s1898_s9, 4  ;;  %s1046_s3 = int_to_ptr.hbm [resolvable:$true] %s1045_s3 }
  0x51   :  { %586 = vmatpush.bf16.msrb.mxu0 %v1187_v8  ;;  %v1335_v8 = vor.u32 %v1545_v5, %v1334_v2  ;;  %v1538_v2 = vld [vmem:[#allocation10 + $0x34] sm:$0xf] }
  0x53   :  { %562 = vmatpush.bf16.msrb.mxu1 %v1167_v27  ;;  %575 = vmatpush.bf16.msrb.mxu3 %v1231_v43  ;;  %v1391_v43 = vor.u32 %v1559_v41, %v1390_v40 }
  0x54   :  { %600 = vmatpush.bf16.msrb.mxu2 %v1243_v35 }
  0x55   :  { %587 = vmatpush.bf16.msrb.mxu0 %v1179_v20  ;;  %v156_v20 = vperm.slane %v153_v57, 1  ;;  %v1323_v57 = vor.u32 %v1540_v54, %v1320_v55 }
  0x57   :  { %563 = vmatpush.bf16.msrb.mxu1 %v1159_v39  ;;  %576 = vmatpush.bf16.msrb.mxu3 %v1223_v51  ;;  %v1327_v39 = vor.u32 %v1543_v38, %v1326_v37  ;;  %v1382_v51 = vld [vmem:[#allocation10 + $0xc0] sm:$0xf]  ;;  %v1549_v37 = vld [vmem:[#allocation10 + $0x84] sm:$0xf0]  ;;  %v1532_v38 = vld [vmem:[#allocation10 + $0x4] sm:$0xf] }
  0x58   :  { %601 = vmatpush.bf16.msrb.mxu2 %v1235_v47 }
  0x59   :  { %588 = vmatpush.bf16.msrb.mxu0 %v1171_v32 }
  0x5b   :  { %814 = vmatpush.bf16.msra.mxu1 %v1343_v58  ;;  %827 = vmatpush.bf16.msra.mxu3 %v1407_v62  ;;  %v1556_v58 = vld [vmem:[#allocation10 + $0xc4] sm:$0xf]  ;;  %v1539_v62 = vld [vmem:[#allocation10 + $0x34] sm:$0xf0] }
  0x5c   :  { %602 = vmatpush.bf16.msrb.mxu2 %v1227_v53  ;;  %v1557_v53 = vld [vmem:[#allocation10 + $0xc4] sm:$0xf0]  ;;  %v1387_v60 = vor.u32 %v1556_v58, %v1384_v59  ;;  %v1311_v0 = vor.u32 %v1539_v62, %v1310_v61 }
  0x5d   :  { %589 = vmatpush.bf16.msrb.mxu0 %v1163_v44  ;;  %v1328_v44 = vld [vmem:[#allocation10 + $0x58] sm:$0xf0]  ;;  %v1383_v56 = vor.u32 %v1557_v53, %v1382_v51  ;;  %v390_v51 = vld [vmem:[%s1893_s4] sm:$0x3]  ;;  %v1577_v53 = vld [vmem:[#allocation11 + $0x68] sm:$0xff] }
  0x5e   :  { %v1331_v47 = vor.u32 %v1542_v42, %v1328_v44  ;;  %v1548_v42 = vld [vmem:[#allocation10 + $0x84] sm:$0xf]  ;;  %v392_v54 = vperm.slane %v390_v51, 0  ;;  %v393_v55 = vperm.slane %v390_v51, 1 }
  0x5f   :  { %815 = vmatpush.bf16.msra.mxu1 %v1335_v8  ;;  %828 = vmatpush.bf16.msra.mxu3 %v1399_v9  ;;  %v1379_v8 = vor.u32 %v1554_v6, %v1376_v7  ;;  %v1302_v9 = vld [vmem:[#allocation10 + $0x20] sm:$0xf] }
  0x60   :  { %853 = vmatpush.bf16.msra.mxu2 %v1411_v4  ;;  %v1303_v12 = vor.u32 %v1537_v10, %v1302_v9  ;;  %v1568_v10 = vld [vmem:[#allocation11 + $0x20] sm:$0xff] }
  0x61   :  { %840 = vmatpush.bf16.msra.mxu0 %v1347_v63  ;;  %v1374_v63 = vld [vmem:[#allocation10 + $0xb0] sm:$0xf] }
  0x62   :  { %v1375_v4 = vor.u32 %v1555_v1, %v1374_v63 }
  0x63   :  { %816 = vmatpush.bf16.msra.mxu1 %v1327_v39  ;;  %829 = vmatpush.bf16.msra.mxu3 %v1391_v43  ;;  %v1288_v39 = vld [vmem:[#allocation10 + $0x8] sm:$0xf0] }
  0x64   :  { %854 = vmatpush.bf16.msra.mxu2 %v1403_v16  ;;  %v1291_v41 = vor.u32 %v1532_v38, %v1288_v39  ;;  %v1352_v43 = vld [vmem:[#allocation10 + $0x88] sm:$0xf0] }
  0x65   :  { %841 = vmatpush.bf16.msra.mxu0 %v1339_v13  ;;  %v1553_v13 = vld [vmem:[#allocation10 + $0xa4] sm:$0xf0]  ;;  %v1355_v44 = vor.u32 %v1548_v42, %v1352_v43 }
  0x66   :  { %v1367_v16 = vor.u32 %v1553_v13, %v1366_v11  ;;  %v1576_v11 = vld [vmem:[#allocation11 + $0x60] sm:$0xff]  ;;  %v1575_v13 = vld [vmem:[#allocation11 + $0x58] sm:$0xff] }
  0x67   :  { %817 = vmatpush.bf16.msra.mxu1 %v1319_v52  ;;  %830 = vmatpush.bf16.msra.mxu3 %v1383_v56  ;;  %v1569_v52 = vld [vmem:[#allocation11 + $0x28] sm:$0xff] }
  0x68   :  { %855 = vmatpush.bf16.msra.mxu2 %v1395_v48  ;;  %v1578_v48 = vld [vmem:[#allocation11 + $0x70] sm:$0xff] }
  0x69   :  { %842 = vmatpush.bf16.msra.mxu0 %v1331_v47  ;;  %v1570_v47 = vld [vmem:[#allocation11 + $0x30] sm:$0xff] }
  0x6b   :  { %818 = vmatpush.bf16.msra.mxu1 %v1311_v0  ;;  %831 = vmatpush.bf16.msra.mxu3 %v1375_v4 }
  0x6c   :  { %856 = vmatpush.bf16.msra.mxu2 %v1387_v60 }
  0x6d   :  { %843 = vmatpush.bf16.msra.mxu0 %v1323_v57 }
  0x6f   :  { %819 = vmatpush.bf16.msra.mxu1 %v1303_v12  ;;  %832 = vmatpush.bf16.msra.mxu3 %v1367_v16  ;;  %v1567_v12 = vld [vmem:[#allocation11 + $0x18] sm:$0xff]  ;;  %v1565_v16 = vld [vmem:[#allocation11 + $0x8] sm:$0xff] }
  0x70   :  { %857 = vmatpush.bf16.msra.mxu2 %v1379_v8 }
  0xb7   :  { %v320_v3 = vpop.f32.mrf.mxu1 }
  0xbd   :  { %v346_v17 = vpop.f32.mrf.mxu3  ;;  %v307_v18 = vpop.f32.mrf.mxu0 }
  0xbe   :  { %v308_v19 = vadd.f32 %v307_v18, %v155_v15  ;;  %v1304_v15 = vld [vmem:[#allocation10 + $0x28] sm:$0xf0]  ;;  %v1552_v18 = vld [vmem:[#allocation10 + $0xa4] sm:$0xf] }
  0xbf   :  { %v322_v21 = vpop.f32.mrf.mxu1 }
  0xc0   :  { %v321_v22 = vadd.f32 %v320_v3, %v308_v19  ;;  %v1312_v3 = vld [vmem:[#allocation10 + $0x38] sm:$0xf0]  ;;  %v1368_v19 = vld [vmem:[#allocation10 + $0xa8] sm:$0xf0]  ;;  %v1294_v21 = vld [vmem:[#allocation10 + $0x10] sm:$0xf] }
  0xc1   :  { %v1315_v5 = vor.u32 %v1538_v2, %v1312_v3 }
  0xc2   :  { %v350_v23 = vpack.c.bf16 %v321_v22, %v321_v22  ;;  %v1535_v22 = vld [vmem:[#allocation10 + $0x14] sm:$0xf0] }
  0xc3   :  { %844 = vmatpush.bf16.msra.mxu0 %v1315_v5 }
  0xc4   :  { %v333_v24 = vpop.f32.mrf.mxu2  ;;  %v352_v26 = vunpack.c.l.bf16 %v350_v23  ;;  %v1358_v23 = vld [vmem:[#allocation10 + $0x90] sm:$0xf] }
  0xc5   :  { %v334_v25 = vadd.f32 %v333_v24, %v156_v20  ;;  %v348_v27 = vpop.f32.mrf.mxu3  ;;  %v309_v29 = vpop.f32.mrf.mxu0  ;;  %v1371_v20 = vor.u32 %v1552_v18, %v1368_v19  ;;  %v1295_v24 = vor.u32 %v1535_v22, %v1294_v21  ;;  %v1564_v18 = vld [vmem:[#allocation11] sm:$0xff] }
  0xc6   :  { %1593 = vtanh.f32 %v352_v26  ;;  %v1534_v26 = vld [vmem:[#allocation10 + $0x14] sm:$0xf]  ;;  %v1296_v27 = vld [vmem:[#allocation10 + $0x18] sm:$0xf0]  ;;  %v1572_v19 = vld [vmem:[#allocation11 + $0x40] sm:$0xff] }
  0xc7   :  { %v347_v28 = vadd.f32 %v346_v17, %v334_v25  ;;  %v1307_v17 = vor.u32 %v1536_v14, %v1304_v15  ;;  %858 = vmatpush.bf16.msra.mxu2 %v1371_v20  ;;  %v1551_v25 = vld [vmem:[#allocation10 + $0x94] sm:$0xf0]  ;;  %v1299_v29 = vor.u32 %v1534_v26, %v1296_v27  ;;  %820 = vmatpush.bf16.msra.mxu1 %v1295_v24  ;;  %v1566_v14 = vld [vmem:[#allocation11 + $0x10] sm:$0xff]  ;;  %v648_v20 = vld [vmem:[%s1895_s6] sm:$0x3] }
  0xc8   :  { %v1574_v15 = vld [vmem:[#allocation11 + $0x50] sm:$0xff]  ;;  %v651_v24 = vperm.slane %v648_v20, 1 }
  0xc9   :  { %v351_v30 = vpack.c.bf16 %v347_v28, %v347_v28  ;;  %845 = vmatpush.bf16.msra.mxu0 %v1307_v17  ;;  %v1359_v28 = vor.u32 %v1551_v25, %v1358_v23  ;;  %v1573_v17 = vld [vmem:[#allocation11 + $0x48] sm:$0xff]  ;;  %v650_v23 = vperm.slane %v648_v20, 0 }
  0xcb   :  { %v353_v31 = vunpack.c.l.bf16 %v351_v30  ;;  %v1550_v30 = vld [vmem:[#allocation10 + $0x94] sm:$0xf]  ;;  %833 = vmatpush.bf16.msra.mxu3 %v1359_v28 }
  0xcc   :  { %v335_v32 = vpop.f32.mrf.mxu2  ;;  %v1594_v33 = vpop.eup %1593 }
  0xcd   :  { %1595 = vtanh.f32 %v353_v31  ;;  %v356_v34 = vpack.c.bf16 %v1594_v33, %v1594_v33  ;;  %v1360_v31 = vld [vmem:[#allocation10 + $0x98] sm:$0xf0]  ;;  %846 = vmatpush.bf16.msra.mxu0 %v1299_v29  ;;  %v1286_v33 = vld [vmem:[#allocation10] sm:$0xf] }
  0xce   :  { %v1363_v32 = vor.u32 %v1550_v30, %v1360_v31 }
  0xcf   :  { %564 = vmatmul.bf16.vlgmr.msrb.gmra.mxu1 %v356_v34  ;;  %590 = vmatmul.bf16.vlgmr.msrb.gmra.mxu0 %v356_v34  ;;  %v1533_v34 = vld [vmem:[#allocation10 + $0x4] sm:$0xf0] }
  0xd0   :  { %859 = vmatpush.bf16.msra.mxu2 %v1363_v32 }
  0xd1   :  { %847 = vmatpush.bf16.msra.mxu0 %v1291_v41 }
  0xd3   :  { %v1596_v35 = vpop.eup %1595 }
  0xd4   :  { %v357_v36 = vpack.c.bf16 %v1596_v35, %v1596_v35  ;;  %v1350_v35 = vld [vmem:[#allocation10 + $0x80] sm:$0xf]  ;;  %860 = vmatpush.bf16.msra.mxu2 %v1355_v44  ;;  %v1592_v44 = vld [vmem:[%s1897_s8] ss:$0 sm:$0xff] }
  0xd5   :  { %v1351_v40 = vor.u32 %v1549_v37, %v1350_v35 }
  0xd6   :  { %577 = vmatmul.bf16.vlgmr.msrb.gmra.mxu3 %v357_v36  ;;  %603 = vmatmul.bf16.vlgmr.msrb.gmra.mxu2 %v357_v36  ;;  %v1287_v36 = vor.u32 %v1533_v34, %v1286_v33 }
  0xd7   :  { %834 = vmatpush.bf16.msra.mxu3 %v1351_v40 }
  0xd8   :  { %821 = vmatpush.bf16.msra.mxu1 %v1287_v36 }
  0xdb   :  { %1019 = vmatpush.bf16.msrb.mxu3 %v1579_v46 }
  0xdc   :  { %1006 = vmatpush.bf16.msrb.mxu1 %v1571_v45 }
  0xdf   :  { %1020 = vmatpush.bf16.msrb.mxu3 %v1578_v48 }
  0xe0   :  { %1007 = vmatpush.bf16.msrb.mxu1 %v1570_v47 }
  0xe3   :  { %1021 = vmatpush.bf16.msrb.mxu3 %v1577_v53 }
  0xe4   :  { %1008 = vmatpush.bf16.msrb.mxu1 %v1569_v52 }
  0xe7   :  { %1022 = vmatpush.bf16.msrb.mxu3 %v1576_v11 }
  0xe8   :  { %1009 = vmatpush.bf16.msrb.mxu1 %v1568_v10 }
  0xeb   :  { %1023 = vmatpush.bf16.msrb.mxu3 %v1575_v13 }
  0xec   :  { %1010 = vmatpush.bf16.msrb.mxu1 %v1567_v12 }
  0xef   :  { %1024 = vmatpush.bf16.msrb.mxu3 %v1574_v15 }
  0xf0   :  { %1011 = vmatpush.bf16.msrb.mxu1 %v1566_v14 }
  0xf3   :  { %1025 = vmatpush.bf16.msrb.mxu3 %v1573_v17 }
  0xf4   :  { %1012 = vmatpush.bf16.msrb.mxu1 %v1565_v16 }
  0xf7   :  { %1026 = vmatpush.bf16.msrb.mxu3 %v1572_v19 }
  0xf8   :  { %1013 = vmatpush.bf16.msrb.mxu1 %v1564_v18 }
 0x14c   :  { %v565_v49 = vpop.f32.mrf.mxu1  ;;  %v591_v50 = vpop.f32.mrf.mxu0 }
 0x14d   :  { %v566_v56 = vadd.f32 %v565_v49, %v392_v54  ;;  %v592_v57 = vadd.f32 %v591_v50, %v393_v55 }
 0x154   :  { %v567_v58 = vpop.f32.mrf.mxu1  ;;  %v593_v59 = vpop.f32.mrf.mxu0 }
 0x159   :  { %v578_v60 = vpop.f32.mrf.mxu3  ;;  %v604_v61 = vpop.f32.mrf.mxu2 }
 0x15a   :  { %v579_v62 = vadd.f32 %v578_v60, %v566_v56  ;;  %v605_v63 = vadd.f32 %v604_v61, %v592_v57 }
 0x15c   :  { %v608_v0 = vpack.c.bf16 %v579_v62, %v579_v62  ;;  %v609_v1 = vpack.c.bf16 %v605_v63, %v605_v63 }
 0x15e   :  { %v610_v2 = vunpack.c.l.bf16 %v608_v0  ;;  %v611_v3 = vunpack.c.l.bf16 %v609_v1 }
 0x160   :  { %1597 = vtanh.f32 %v610_v2 }
 0x161   :  { %1599 = vtanh.f32 %v611_v3  ;;  %v580_v4 = vpop.f32.mrf.mxu3  ;;  %v606_v5 = vpop.f32.mrf.mxu2 }
 0x166   :  { %v1598_v6 = vpop.eup %1597 }
 0x167   :  { %v1600_v7 = vpop.eup %1599  ;;  %v614_v8 = vpack.c.bf16 %v1598_v6, %v1598_v6 }
 0x168   :  { %v615_v9 = vpack.c.bf16 %v1600_v7, %v1600_v7 }
 0x169   :  { %822 = vmatmul.bf16.vlgmr.msra.gmra.mxu1 %v614_v8  ;;  %848 = vmatmul.bf16.vlgmr.msra.gmra.mxu0 %v614_v8 }
 0x16a   :  { %835 = vmatmul.bf16.vlgmr.msra.gmra.mxu3 %v615_v9  ;;  %861 = vmatmul.bf16.vlgmr.msra.gmra.mxu2 %v615_v9 }
 0x1e6   :  { %v823_v21 = vpop.f32.mrf.mxu1  ;;  %v849_v22 = vpop.f32.mrf.mxu0 }
 0x1e7   :  { %v824_v25 = vadd.f32 %v823_v21, %v650_v23  ;;  %v850_v26 = vadd.f32 %v849_v22, %v651_v24 }
 0x1ed   :  { %v836_v27 = vpop.f32.mrf.mxu3  ;;  %v862_v28 = vpop.f32.mrf.mxu2 }
 0x1ee   :  { %v837_v29 = vadd.f32 %v836_v27, %v824_v25  ;;  %v863_v30 = vadd.f32 %v862_v28, %v850_v26  ;;  %v825_v31 = vpop.f32.mrf.mxu1  ;;  %v851_v32 = vpop.f32.mrf.mxu0 }
 0x1f0   :  { %v866_v33 = vpack.c.bf16 %v837_v29, %v837_v29  ;;  %v867_v34 = vpack.c.bf16 %v863_v30, %v863_v30 }
 0x1f2   :  { %v868_v35 = vunpack.c.l.bf16 %v866_v33  ;;  %v869_v36 = vunpack.c.l.bf16 %v867_v34 }
 0x1f4   :  { %1601 = vtanh.f32 %v868_v35 }
 0x1f5   :  { %1603 = vtanh.f32 %v869_v36  ;;  %v838_v37 = vpop.f32.mrf.mxu3  ;;  %v864_v38 = vpop.f32.mrf.mxu2 }
 0x1fa   :  { %v1602_v39 = vpop.eup %1601 }
 0x1fb   :  { %v1604_v40 = vpop.eup %1603  ;;  %v872_v41 = vpack.c.bf16 %v1602_v39, %v1602_v39 }
 0x1fc   :  { %v873_v42 = vpack.c.bf16 %v1604_v40, %v1604_v40 }
 0x1fd   :  { %1014 = vmatmul.bf16.vlgmr.msrb.gmra.mxu1 %v872_v41 }
 0x1fe   :  { %1027 = vmatmul.bf16.vlgmr.msrb.gmra.mxu3 %v873_v42 }
 0x27a   :  { %v1015_v43 = vpop.f32.mrf.mxu1 }
 0x27b   :  { %v1016_v45 = vadd.f32 %v1592_v44, %v1015_v43 }
 0x281   :  { %v1028_v46 = vpop.f32.mrf.mxu3 }
 0x282   :  { %v1029_v47 = vadd.f32 %v1028_v46, %v1016_v45  ;;  %v1017_v48 = vpop.f32.mrf.mxu1 }
 0x284   :  { %v1032_v49 = vpack.c.bf16 %v1029_v47, %v1029_v47 }
 0x286   :  { %v1033_v50 = vunpack.c.l.bf16 %v1032_v49 }
 0x288   :  { %1605 = vtanh.f32 %v1033_v50 }
 0x289   :  { %v1030_v51 = vpop.f32.mrf.mxu3 }
 0x28e   :  { %v1606_v52 = vpop.eup %1605 }
 0x28f   :  { %v1035_v53 = vpack.c.bf16 %v1606_v52, %v1606_v52 }
 0x291   :  { %v1036_v54 = vunpack.c.l.bf16 %v1035_v53 }
 0x293   :  { %1037 = vst [vmem:[#allocation13] sm:$0xff] %v1036_v54 }
 0x294   :  { %1048 = dma.vmem_to_hbm [thread:$0]  %s1044_s21, 128, %s1046_s3, [#allocation4]  }
 0x295   :  { %1783 = dma.done.wait [#allocation4], 128  }
 0x296   :  { %1784 = vsyncadd [#allocation4], 4294967168 }
 0x297   :  { %1053 = vsyncpa [#allocation3], 1 }
 0x298   :  { %1054 = vsyncpa [#allocation6], 1 }
 0x299   :  { %1055 = vsyncpa [#allocation9], 1 }
 0x29a   :  { %1056 = vsyncpa [#allocation12], 1 }
 0x29b   :  { %1057 = vsyncpa [#allocation4], 1 }

</bundles_post_ra>
